<compile_context>
chip_gen: v7x
topology: tpu7x:2x2x1
jax: 0.10.0
libtpu: 0.0.40
codegen_flags: <defaults>
</compile_context>

<pallas_src>
import functools
import math

import jax
import jax.numpy as jnp
import numpy as np
from jax.experimental import pallas as pl
from jax.experimental.pallas import tpu as pltpu

VMEM_SPEC = pl.BlockSpec(memory_space=pltpu.MemorySpace.VMEM)

LANE = 128  # lane-dense padded width


def _round_up(x, m):
    return ((x + m - 1) // m) * m


def _pad_dim(d):
    return max(LANE, _round_up(d, LANE))


# ----------------------------- Pallas kernels ------------------------------

def _view_kernel(x_ref, adj_ref, mt_ref, emb_w_ref, emb_b_ref,
                 gnn_w_ref, gnn_b_ref, pooled_ref, *, n_steps, n_graphs):
    """One view: embedding + all GNN steps + per-graph max pool, fully fused."""
    x = x_ref[...]            # (N, Din)
    adj = adj_ref[...]        # (N, N)

    # Embedding: ReLU(x @ W + b)   -> (N, HP) lane-dense
    h = jnp.maximum(
        jnp.dot(x, emb_w_ref[...], preferred_element_type=jnp.float32)
        + emb_b_ref[...], 0.0)

    # GNN message-passing steps (statically unrolled).
    # The two matmuls are fused: [h | A·h] @ [[W_self];[W_neigh]]  (K = 2*HP).
    for s in range(n_steps):
        agg = jnp.dot(adj, h, preferred_element_type=jnp.float32)        # (N, HP)
        hcat = jnp.concatenate([h, agg], axis=-1)                        # (N, 2*HP)
        h = jnp.maximum(
            jnp.dot(hcat, gnn_w_ref[s], preferred_element_type=jnp.float32)
            + gnn_b_ref[s], 0.0)

    # Global max pool per graph: build the whole (G, HP) block, single store.
    mt = mt_ref[...]                                                     # (N, G)
    rows = []
    for g in range(n_graphs):                                            # tiny static loop
        masked = jnp.where(mt[:, g:g + 1] > 0.5, h, jnp.float32(-1e30))
        rows.append(jnp.max(masked, axis=0, keepdims=True))              # (1, HP)
    pooled_ref[...] = jnp.concatenate(rows, axis=0)                      # (G, HP)


def pallas_mvg_views(x_all, adj_all, member_t, emb_w, emb_b, gnn_w, gnn_b,
                     n_graphs):
    n_views, n_nodes, din = x_all.shape
    n_steps = gnn_w.shape[0]
    hp = emb_w.shape[1]
    return pl.pallas_call(
        functools.partial(_view_kernel, n_steps=n_steps, n_graphs=n_graphs),
        out_shape=jax.ShapeDtypeStruct((n_views, n_graphs, hp), jnp.float32),
        grid=(n_views,),
        in_specs=[
            pl.BlockSpec((None, n_nodes, din), lambda v: (v, 0, 0)),      # x
            pl.BlockSpec((None, n_nodes, n_nodes), lambda v: (v, 0, 0)),  # adj
            pl.BlockSpec((n_nodes, n_graphs), lambda v: (0, 0)),          # member_t (resident)
            pl.BlockSpec((din, hp), lambda v: (0, 0)),                    # emb_w  (resident)
            pl.BlockSpec((1, hp), lambda v: (0, 0)),                      # emb_b  (resident)
            pl.BlockSpec((n_steps, 2 * hp, hp), lambda v: (0, 0, 0)),     # gnn_w  (resident)
            pl.BlockSpec((n_steps, 1, hp), lambda v: (0, 0, 0)),          # gnn_b  (resident)
        ],
        out_specs=pl.BlockSpec((None, n_graphs, hp), lambda v: (v, 0, 0)),
        compiler_params=pltpu.CompilerParams(
            dimension_semantics=("parallel",)),   # 2 TCs on v7x take half the views each
    )(x_all, adj_all, member_t, emb_w, emb_b, gnn_w, gnn_b)


def _decoder_kernel(pooled_ref, *refs, n_views, n_layers):
    """Concat of pooled views + full MLP decoder in one kernel."""
    o_ref = refs[-1]
    # concat along lanes: view v occupies lanes [v*HP, (v+1)*HP)
    feat = jnp.concatenate([pooled_ref[v] for v in range(n_views)], axis=-1)
    h = feat
    for i in range(n_layers):
        w = refs[2 * i][...]
        b = refs[2 * i + 1][...]
        h = jnp.dot(h, w, preferred_element_type=jnp.float32) + b
        if i < n_layers - 1:
            h = jnp.maximum(h, 0.0)
    # TODO(synk): Classifier dropout is an eval-time no-op and is omitted.
    o_ref[...] = h.astype(o_ref.dtype)


def pallas_decoder(pooled, dec_params, n_graphs, out_dim):
    n_views = pooled.shape[0]
    n_layers = len(dec_params)
    flat = []
    for (w, b) in dec_params:
        flat.extend([w, b])
    return pl.pallas_call(
        functools.partial(_decoder_kernel, n_views=n_views, n_layers=n_layers),
        out_shape=jax.ShapeDtypeStruct((n_graphs, out_dim), jnp.float32),
        in_specs=[VMEM_SPEC] * (1 + len(flat)),
        out_specs=VMEM_SPEC,
    )(pooled, *flat)


# --------------------------- parameters & padding ---------------------------

def _glorot(key, shape):
    fan_in, fan_out = shape
    s = math.sqrt(6.0 / (fan_in + fan_out))
    return jax.random.uniform(key, shape, jnp.float32, -s, s)


def init_params(key, node_in, hidden, n_steps, n_dec_layers, n_subgs, out_dim):
    keys = iter(jax.random.split(key, 1 + 2 * n_steps + n_dec_layers))
    params = {
        "emb_w": _glorot(next(keys), (node_in, hidden)),
        "emb_b": jnp.zeros((hidden,), jnp.float32),
        "gnn": [],
        "dec": [],
    }
    for _ in range(n_steps):
        params["gnn"].append((
            _glorot(next(keys), (hidden, hidden)),   # W_self
            _glorot(next(keys), (hidden, hidden)),   # W_neigh
            jnp.zeros((hidden,), jnp.float32),
        ))
    dims = [hidden * n_subgs] + [hidden * n_subgs] * (n_dec_layers - 1) + [out_dim]
    for i in range(n_dec_layers):
        params["dec"].append((
            _glorot(next(keys), (dims[i], dims[i + 1])),
            jnp.zeros((dims[i + 1],), jnp.float32),
        ))
    return params


def pad_params_for_tpu(params, n_subgs):
    """Zero-pad all feature dims to 128 lanes and stack / fuse GNN weights."""
    hidden = params["emb_w"].shape[1]
    hp = _pad_dim(hidden)

    emb_w = jnp.pad(params["emb_w"], ((0, 0), (0, hp - hidden)))
    emb_b = jnp.pad(params["emb_b"], (0, hp - hidden)).reshape(1, hp)

    gnn_w, gnn_b = [], []
    for (w_self, w_neigh, b) in params["gnn"]:
        # stacked weight for the fused [h | A·h] matmul; padded rows/cols are zero
        w = jnp.zeros((2 * hp, hp), jnp.float32)
        w = w.at[:hidden, :hidden].set(w_self)
        w = w.at[hp:hp + hidden, :hidden].set(w_neigh)
        gnn_w.append(w)
        gnn_b.append(jnp.pad(b, (0, hp - hidden)).reshape(1, hp))
    gnn_w = jnp.stack(gnn_w)   # (n_steps, 2*HP, HP)
    gnn_b = jnp.stack(gnn_b)   # (n_steps, 1, HP)

    dec = []
    n_dec = len(params["dec"])
    in_dim_pad = n_subgs * hp          # padded concat width (view-blocked lanes)
    for i, (w, b) in enumerate(params["dec"]):
        din, dout = w.shape
        last = (i == n_dec - 1)
        dout_pad = dout if last else _pad_dim(dout)
        wp = jnp.zeros((in_dim_pad, dout_pad), jnp.float32)
        if i == 0:
            per_view = din // n_subgs   # == hidden
            for v in range(n_subgs):
                wp = wp.at[v * hp:v * hp + per_view, :dout].set(
                    w[v * per_view:(v + 1) * per_view, :])
        else:
            wp = wp.at[:din, :dout].set(w)
        bp = jnp.pad(b, (0, dout_pad - dout)).reshape(1, dout_pad)
        dec.append((wp, bp))
        in_dim_pad = dout_pad
    return {"emb_w": emb_w, "emb_b": emb_b, "gnn_w": gnn_w, "gnn_b": gnn_b,
            "dec": dec}


# --------------------------------- forward ----------------------------------

def mvg_forward(padded_params, x_all, adj_all, member_t, n_graphs, out_dim):
    pooled = pallas_mvg_views(
        x_all, adj_all, member_t,
        padded_params["emb_w"], padded_params["emb_b"],
        padded_params["gnn_w"], padded_params["gnn_b"], n_graphs)
    return pallas_decoder(pooled, padded_params["dec"], n_graphs, out_dim)


def mvg_reference(params, x_all, adj_all, member_t):
    pooled = []
    for v in range(x_all.shape[0]):
        x, adj = x_all[v], adj_all[v]
        h = jnp.maximum(x @ params["emb_w"] + params["emb_b"], 0.0)
        for (w_self, w_neigh, b) in params["gnn"]:
            h = jnp.maximum(h @ w_self + (adj @ h) @ w_neigh + b, 0.0)
        member = member_t.T                          # [G, N]
        masked = jnp.where(member[:, :, None] > 0.5, h[None], -1e30)
        pooled.append(jnp.max(masked, axis=1))
    h = jnp.concatenate(pooled, axis=-1)             # torch.cat(out, dim=-1)
    for i, (w, b) in enumerate(params["dec"]):
        h = h @ w + b
        if i < len(params["dec"]) - 1:
            h = jnp.maximum(h, 0.0)
    return h


# ----------------------------------- main -----------------------------------

if __name__ == "__main__":
    n_subgs = 2          # number of subgraph views
    n_graphs = 2         # graphs in the batch
    nodes_per_graph = 8
    n_nodes = n_graphs * nodes_per_graph
    node_input_dim = 8
    node_hidden_dim = 32
    n_step_mp = 2
    n_layer_decoder = 2
    output_dim = 4

    key = jax.random.PRNGKey(0)
    kp, kd = jax.random.split(key)
    params = init_params(kp, node_input_dim, node_hidden_dim, n_step_mp,
                         n_layer_decoder, n_subgs, output_dim)
    padded_params = pad_params_for_tpu(params, n_subgs)

    # graph membership: nodes [0..7] -> graph 0, [8..15] -> graph 1
    batch = jnp.repeat(jnp.arange(n_graphs), nodes_per_graph)
    member_t = jax.nn.one_hot(batch, n_graphs, dtype=jnp.float32)   # [N, G]
    same_graph = (batch[:, None] == batch[None, :]).astype(jnp.float32)

    xs, adjs = [], []
    for s in range(n_subgs):
        kx, ka, kd = jax.random.split(kd, 3)
        x = jax.random.normal(kx, (n_nodes, node_input_dim), jnp.float32)
        a = (jax.random.uniform(ka, (n_nodes, n_nodes)) < 0.3).astype(jnp.float32)
        adj = jnp.maximum(a, a.T) * same_graph        # symmetric 0/1, block-diagonal
        xs.append(x)
        adjs.append(adj)
    x_all = jnp.stack(xs)       # (n_subgs, N, Din)
    adj_all = jnp.stack(adjs)   # (n_subgs, N, N)

    out = mvg_forward(padded_params, x_all, adj_all, member_t, n_graphs,
                      output_dim)
    out = jax.block_until_ready(out)

    ref = mvg_reference(params, x_all, adj_all, member_t)
    np.testing.assert_allclose(np.asarray(out), np.asarray(ref),
                               rtol=1e-4, atol=1e-4)
    assert out.shape == (n_graphs, output_dim)
    print("KERNEL_OK")
</pallas_src>

<mosaic_0001>
module attributes {stable_mosaic.version = 11 : i64} {
  func.func @_view_kernel(%arg0: i32, %arg1: memref<1x16x8xf32, #tpu.memory_space<vmem>>, %arg2: memref<1x16x16xf32, #tpu.memory_space<vmem>>, %arg3: memref<16x2xf32, #tpu.memory_space<vmem>>, %arg4: memref<8x128xf32, #tpu.memory_space<vmem>>, %arg5: memref<1x128xf32, #tpu.memory_space<vmem>>, %arg6: memref<2x256x128xf32, #tpu.memory_space<vmem>>, %arg7: memref<2x1x128xf32, #tpu.memory_space<vmem>>, %arg8: memref<1x2x128xf32, #tpu.memory_space<vmem>>) attributes {dimension_semantics = [#tpu.dimension_semantics<parallel>], iteration_bounds = array<i64: 2>, scalar_prefetch = 0 : i64, scratch_operands = 0 : i64, tpu.core_type = #tpu.core_type<tc>, window_params = [{transform_indices = @transform_0, window_bounds = array<i64: 1, 16, 8>}, {transform_indices = @transform_1, window_bounds = array<i64: 1, 16, 16>}, {pipeline_mode = #tpu.pipeline_mode<synchronous>, transform_indices = @transform_2, window_bounds = array<i64: 16, 2>}, {pipeline_mode = #tpu.pipeline_mode<synchronous>, transform_indices = @transform_3, window_bounds = array<i64: 8, 128>}, {pipeline_mode = #tpu.pipeline_mode<synchronous>, transform_indices = @transform_4, window_bounds = array<i64: 1, 128>}, {pipeline_mode = #tpu.pipeline_mode<synchronous>, transform_indices = @transform_5, window_bounds = array<i64: 2, 256, 128>}, {pipeline_mode = #tpu.pipeline_mode<synchronous>, transform_indices = @transform_6, window_bounds = array<i64: 2, 1, 128>}, {transform_indices = @transform_7, window_bounds = array<i64: 1, 2, 128>}]} {
    %c0 = arith.constant 0 : index
    %c0_0 = arith.constant 0 : index
    %c0_1 = arith.constant 0 : index
    %0 = vector.load %arg1[%c0, %c0_0, %c0_1] : memref<1x16x8xf32, #tpu.memory_space<vmem>>, vector<1x16x8xf32>
    %1 = vector.shape_cast %0 : vector<1x16x8xf32> to vector<16x8xf32>
    %c0_2 = arith.constant 0 : index
    %c0_3 = arith.constant 0 : index
    %c0_4 = arith.constant 0 : index
    %2 = vector.load %arg2[%c0_2, %c0_3, %c0_4] : memref<1x16x16xf32, #tpu.memory_space<vmem>>, vector<1x16x16xf32>
    %3 = vector.shape_cast %2 : vector<1x16x16xf32> to vector<16x16xf32>
    %c0_5 = arith.constant 0 : index
    %c0_6 = arith.constant 0 : index
    %4 = vector.load %arg4[%c0_5, %c0_6] : memref<8x128xf32, #tpu.memory_space<vmem>>, vector<8x128xf32>
    %cst = arith.constant dense<0.000000e+00> : vector<16x128xf32>
    %5 = tpu.matmul %1, %4, %cst {dimension_numbers = #tpu.dot_dimension_numbers<[1], [0], [0], [1], [0, 0, 1, 1], [], []>} : vector<16x8xf32>, vector<8x128xf32>, vector<16x128xf32> -> vector<16x128xf32>
    %c0_7 = arith.constant 0 : index
    %c0_8 = arith.constant 0 : index
    %6 = vector.load %arg5[%c0_7, %c0_8] : memref<1x128xf32, #tpu.memory_space<vmem>>, vector<1x128xf32>
    %7 = vector.broadcast %6 : vector<1x128xf32> to vector<16x128xf32>
    %8 = arith.addf %5, %7 : vector<16x128xf32>
    %cst_9 = arith.constant 0.000000e+00 : f32
    %9 = vector.broadcast %cst_9 : f32 to vector<16x128xf32>
    %10 = arith.maximumf %8, %9 : vector<16x128xf32>
    %cst_10 = arith.constant dense<0.000000e+00> : vector<16x128xf32>
    %11 = tpu.matmul %3, %10, %cst_10 {dimension_numbers = #tpu.dot_dimension_numbers<[1], [0], [0], [1], [0, 0, 1, 1], [], []>} : vector<16x16xf32>, vector<16x128xf32>, vector<16x128xf32> -> vector<16x128xf32>
    %12 = tpu.concatenate %10, %11 in 1 : vector<16x128xf32>, vector<16x128xf32> -> vector<16x256xf32>
    %c0_11 = arith.constant 0 : index
    %c0_12 = arith.constant 0 : index
    %c0_13 = arith.constant 0 : index
    %13 = vector.load %arg6[%c0_11, %c0_12, %c0_13] : memref<2x256x128xf32, #tpu.memory_space<vmem>>, vector<1x256x128xf32>
    %14 = vector.shape_cast %13 : vector<1x256x128xf32> to vector<256x128xf32>
    %cst_14 = arith.constant dense<0.000000e+00> : vector<16x128xf32>
    %15 = tpu.matmul %12, %14, %cst_14 {dimension_numbers = #tpu.dot_dimension_numbers<[1], [0], [0], [1], [0, 0, 1, 1], [], []>} : vector<16x256xf32>, vector<256x128xf32>, vector<16x128xf32> -> vector<16x128xf32>
    %c0_15 = arith.constant 0 : index
    %c0_16 = arith.constant 0 : index
    %c0_17 = arith.constant 0 : index
    %16 = vector.load %arg7[%c0_15, %c0_16, %c0_17] : memref<2x1x128xf32, #tpu.memory_space<vmem>>, vector<1x1x128xf32>
    %17 = vector.shape_cast %16 : vector<1x1x128xf32> to vector<1x128xf32>
    %18 = vector.broadcast %17 : vector<1x128xf32> to vector<16x128xf32>
    %19 = arith.addf %15, %18 : vector<16x128xf32>
    %cst_18 = arith.constant 0.000000e+00 : f32
    %20 = vector.broadcast %cst_18 : f32 to vector<16x128xf32>
    %21 = arith.maximumf %19, %20 : vector<16x128xf32>
    %cst_19 = arith.constant dense<0.000000e+00> : vector<16x128xf32>
    %22 = tpu.matmul %3, %21, %cst_19 {dimension_numbers = #tpu.dot_dimension_numbers<[1], [0], [0], [1], [0, 0, 1, 1], [], []>} : vector<16x16xf32>, vector<16x128xf32>, vector<16x128xf32> -> vector<16x128xf32>
    %23 = tpu.concatenate %21, %22 in 1 : vector<16x128xf32>, vector<16x128xf32> -> vector<16x256xf32>
    %c1 = arith.constant 1 : index
    %c0_20 = arith.constant 0 : index
    %c0_21 = arith.constant 0 : index
    %24 = vector.load %arg6[%c1, %c0_20, %c0_21] : memref<2x256x128xf32, #tpu.memory_space<vmem>>, vector<1x256x128xf32>
    %25 = vector.shape_cast %24 : vector<1x256x128xf32> to vector<256x128xf32>
    %cst_22 = arith.constant dense<0.000000e+00> : vector<16x128xf32>
    %26 = tpu.matmul %23, %25, %cst_22 {dimension_numbers = #tpu.dot_dimension_numbers<[1], [0], [0], [1], [0, 0, 1, 1], [], []>} : vector<16x256xf32>, vector<256x128xf32>, vector<16x128xf32> -> vector<16x128xf32>
    %c1_23 = arith.constant 1 : index
    %c0_24 = arith.constant 0 : index
    %c0_25 = arith.constant 0 : index
    %27 = vector.load %arg7[%c1_23, %c0_24, %c0_25] : memref<2x1x128xf32, #tpu.memory_space<vmem>>, vector<1x1x128xf32>
    %28 = vector.shape_cast %27 : vector<1x1x128xf32> to vector<1x128xf32>
    %29 = vector.broadcast %28 : vector<1x128xf32> to vector<16x128xf32>
    %30 = arith.addf %26, %29 : vector<16x128xf32>
    %cst_26 = arith.constant 0.000000e+00 : f32
    %31 = vector.broadcast %cst_26 : f32 to vector<16x128xf32>
    %32 = arith.maximumf %30, %31 : vector<16x128xf32>
    %c0_27 = arith.constant 0 : index
    %c0_28 = arith.constant 0 : index
    %33 = vector.load %arg3[%c0_27, %c0_28] : memref<16x2xf32, #tpu.memory_space<vmem>>, vector<16x2xf32>
    %34 = vector.extract_strided_slice %33 {offsets = [0, 0], sizes = [16, 1], strides = [1, 1]} : vector<16x2xf32> to vector<16x1xf32>
    %cst_29 = arith.constant 5.000000e-01 : f32
    %35 = vector.broadcast %cst_29 : f32 to vector<16x1xf32>
    %36 = arith.cmpf ogt, %34, %35 : vector<16x1xf32>
    %cst_30 = arith.constant -1.000000e+30 : f32
    %37 = vector.shape_cast %36 : vector<16x1xi1> to vector<16x1xi1>
    %38 = vector.broadcast %37 : vector<16x1xi1> to vector<16x128xi1>
    %39 = vector.broadcast %cst_30 : f32 to vector<16x128xf32>
    %40 = arith.select %38, %32, %39 : vector<16x128xi1>, vector<16x128xf32>
    %cst_31 = arith.constant dense<0xFF800000> : vector<128xf32>
    %41 = vector.multi_reduction <maximumf>, %40, %cst_31 [0] : vector<16x128xf32> to vector<128xf32>
    %42 = vector.shape_cast %41 : vector<128xf32> to vector<1x128xf32>
    %43 = vector.extract_strided_slice %33 {offsets = [0, 1], sizes = [16, 1], strides = [1, 1]} : vector<16x2xf32> to vector<16x1xf32>
    %cst_32 = arith.constant 5.000000e-01 : f32
    %44 = vector.broadcast %cst_32 : f32 to vector<16x1xf32>
    %45 = arith.cmpf ogt, %43, %44 : vector<16x1xf32>
    %cst_33 = arith.constant -1.000000e+30 : f32
    %46 = vector.shape_cast %45 : vector<16x1xi1> to vector<16x1xi1>
    %47 = vector.broadcast %46 : vector<16x1xi1> to vector<16x128xi1>
    %48 = vector.broadcast %cst_33 : f32 to vector<16x128xf32>
    %49 = arith.select %47, %32, %48 : vector<16x128xi1>, vector<16x128xf32>
    %cst_34 = arith.constant dense<0xFF800000> : vector<128xf32>
    %50 = vector.multi_reduction <maximumf>, %49, %cst_34 [0] : vector<16x128xf32> to vector<128xf32>
    %51 = vector.shape_cast %50 : vector<128xf32> to vector<1x128xf32>
    %52 = tpu.concatenate %42, %51 in 0 : vector<1x128xf32>, vector<1x128xf32> -> vector<2x128xf32>
    %c0_35 = arith.constant 0 : index
    %c0_36 = arith.constant 0 : index
    %c0_37 = arith.constant 0 : index
    %53 = vector.load %arg8[%c0_35, %c0_36, %c0_37] : memref<1x2x128xf32, #tpu.memory_space<vmem>>, vector<1x2x128xf32>
    %54 = vector.shape_cast %53 : vector<1x2x128xf32> to vector<2x128xf32>
    %55 = vector.shape_cast %52 : vector<2x128xf32> to vector<1x2x128xf32>
    tpu.vector_store %arg8[%c0_35, %c0_36, %c0_37], %55 {strides = array<i32>} : memref<1x2x128xf32, #tpu.memory_space<vmem>>, vector<1x2x128xf32>,
    return
  }
  func.func @transform_0(%arg0: i32) -> (i32, i32, i32) {
    %c0_i32 = arith.constant 0 : i32
    %c0_i32_0 = arith.constant 0 : i32
    %c0_i32_1 = arith.constant 0 : i32
    return %arg0, %c0_i32, %c0_i32_0 : i32, i32, i32
  }
  func.func @transform_1(%arg0: i32) -> (i32, i32, i32) {
    %c0_i32 = arith.constant 0 : i32
    %c0_i32_0 = arith.constant 0 : i32
    %c0_i32_1 = arith.constant 0 : i32
    return %arg0, %c0_i32, %c0_i32_0 : i32, i32, i32
  }
  func.func @transform_2(%arg0: i32) -> (i32, i32) {
    %c0_i32 = arith.constant 0 : i32
    %c0_i32_0 = arith.constant 0 : i32
    %c0_i32_1 = arith.constant 0 : i32
    return %c0_i32, %c0_i32_0 : i32, i32
  }
  func.func @transform_3(%arg0: i32) -> (i32, i32) {
    %c0_i32 = arith.constant 0 : i32
    %c0_i32_0 = arith.constant 0 : i32
    %c0_i32_1 = arith.constant 0 : i32
    return %c0_i32, %c0_i32_0 : i32, i32
  }
  func.func @transform_4(%arg0: i32) -> (i32, i32) {
    %c0_i32 = arith.constant 0 : i32
    %c0_i32_0 = arith.constant 0 : i32
    %c0_i32_1 = arith.constant 0 : i32
    return %c0_i32, %c0_i32_0 : i32, i32
  }
  func.func @transform_5(%arg0: i32) -> (i32, i32, i32) {
    %c0_i32 = arith.constant 0 : i32
    %c0_i32_0 = arith.constant 0 : i32
    %c0_i32_1 = arith.constant 0 : i32
    %c0_i32_2 = arith.constant 0 : i32
    return %c0_i32, %c0_i32_0, %c0_i32_1 : i32, i32, i32
  }
  func.func @transform_6(%arg0: i32) -> (i32, i32, i32) {
    %c0_i32 = arith.constant 0 : i32
    %c0_i32_0 = arith.constant 0 : i32
    %c0_i32_1 = arith.constant 0 : i32
    %c0_i32_2 = arith.constant 0 : i32
    return %c0_i32, %c0_i32_0, %c0_i32_1 : i32, i32, i32
  }
  func.func @transform_7(%arg0: i32) -> (i32, i32, i32) {
    %c0_i32 = arith.constant 0 : i32
    %c0_i32_0 = arith.constant 0 : i32
    %c0_i32_1 = arith.constant 0 : i32
    return %arg0, %c0_i32, %c0_i32_0 : i32, i32, i32
  }
}

</mosaic_0001>

<bundles_post_ra>
// kernel: tpu_custom_call.1
= control target key start
LH: loop header
LB: loop body
LE: loop exit
PB: predicated region body
PF: predicated region fallthrough
CT: control target
= control target key end

     0   :  { %12 = vsyncpa [#allocation3], 0  ;;  %s1535_s0 = inlined_call_operand.vmem [shape: f32[2,16,8], index: 0, kind: input, shape index: {}]   ;;  %s1536_s1 = inlined_call_operand.vmem [shape: f32[2,16,16], index: 1, kind: input, shape index: {}]   ;;  %s1537_s2 = inlined_call_operand.vmem [shape: f32[16,2], index: 2, kind: input, shape index: {}]   ;;  %s1538_s3 = inlined_call_operand.vmem [shape: f32[8,128], index: 3, kind: input, shape index: {}]   ;;  %s1539_s4 = inlined_call_operand.vmem [shape: f32[1,128], index: 4, kind: input, shape index: {}]   ;;  %s1540_s5 = inlined_call_operand.hbm [shape: f32[2,256,128], index: 5, kind: input, shape index: {}]   ;;  %s1541_s6 = inlined_call_operand.vmem [shape: f32[2,1,128], index: 6, kind: input, shape index: {}]   ;;  %s1542_s7 = inlined_call_operand.hbm [shape: f32[2,2,128], index: 7, kind: output, shape index: {}]  }
   0x1   :  { %13 = vsyncpa [#allocation4], 0 }
   0x2   :  { %15 = vsyncpa [#allocation4 + $0x1], 0  ;;  %s1343_s24 = smov 0   ;;  %s1345_s25 = smov 0  }
   0x3   :  { %s1347_s26 = smov 0   ;;  %s1349_s27 = smov 0  }
   0x4 LB: > { %s1364_s28 = sadd.s32 4294967295, %s1295_s27   ;;  %s939_s29 = sadd.s32 4294967294, %s1295_s27   ;;  %s1295_s27 = sphi %s1349_s27, %s1558_s27   ;;  %s1291_s26 = sphi %s1347_s26, %s1557_s26   ;;  %s1287_s25 = sphi %s1345_s25, %s1556_s25   ;;  %s1283_s24 = sphi %s1343_s24, %s1555_s24  }
   0x5   : > { %s1368_s30 = sadd.s32 1, %s1295_s27   ;;  %s185_s8 = sadd.s32 1, %s1291_s26 }
   0x6   : > { %s182_s9 = ssub.s32 %s1295_s27, %s1368_s30  ;;  %p195_p0 = scmp.ne.s32.totalorder %s1291_s26, %s1287_s25 }
   0x7   : > { %p183_p1 = scmp.eq.s32.totalorder %s182_s9, 0  ;;  %p196_p2 = scmp.eq.s32.totalorder %s1364_s28, 1 }
   0x8   : > { %p201_p3 = scmp.ne.s32.totalorder %s1287_s25, %s1283_s24  ;;  %p202_p4 = scmp.eq.s32.totalorder %s939_s29, 1 }
   0x9   : > { %s1379_s10 = scalar_select %p183_p1, %s1291_s26, %s185_s8  }
   0xa   : > { %p1381_p5 = por %p196_p2, %p195_p0  ;;  %p1385_p6 = por %p202_p4, %p201_p3 }
   0xb   : > { %p940_p7 = scmp.ge.s32.totalorder %s1295_s27, 1  ;;  %p209_p8 = scmp.lt.s32.totalorder %s1295_s27, 3 }
   0xc   : > { %s1546_s11 = scalar_select %p1381_p5, 1, 0 }
   0xd   : > { %s1547_s12 = scalar_select %p1385_p6, 1, 0 }
   0xe   : > { %p1543_p9 = scmp.eq.s32.totalorder %s1364_s28, 0  ;;  %p1392_p10 = pnand %p940_p7, %p209_p8 }
   0xf   : > { %s1297_s14 = smov [#allocation2]   ;;  %s1201_s19 = scalar_lea.hbm %s1540_s5, 8192 }
  0x10   : > { %s1548_s13 = scalar_select %p1392_p10, 1, 0 }
  0x11   : > { %s230_s15 = sshll.u32 %s1297_s14, 4  ;;  %p1150_p11 = pneg %p1392_p10  ;;  %s231_s15 = int_to_ptr.vmem [resolvable:$true] %s230_s15 }
  0x12   : > { %p1202_p13 = scmp.ne.s32.totalorder %s1540_s5, %s1201_s19  ;;  %p1208_p3 = scmp.lt.u32.totalorder %s1201_s19, %s1540_s5 }
  0x13   : > { %p1400_p12 = pnand %p1543_p9, %p1150_p11 }
  0x15   : > { %p1203_p0 = pneg %p1400_p12 }
  0x17   : > { %p1204_p1 = pnand %p1203_p0, %p1202_p13 }
  0x19   : > { %p1205_p2 = pneg %p1204_p1 }
  0x1b   : > { %p1210_p4 = pnand %p1208_p3, %p1205_p2 }
  0x1d   : > { %1213 = shalt.err (!%p1210_p4)
}
  0x1e   : > { %s1214_s29 = scalar_lea.vmem %s231_s15, 8192  ;;  %p1222_p9 = scmp.lt.s32.totalorder %s231_s15, %s231_s15 }
  0x1f   : > { %p1215_p7 = scmp.ne.s32.totalorder %s231_s15, %s1214_s29  ;;  %p1223_p6 = scmp.lt.s32.totalorder %s1214_s29, %s1214_s29 }
  0x21   : > { %p1217_p8 = pnand %p1215_p7, %p1203_p0  ;;  %p1224_p5 = por %p1223_p6, %p1222_p9 }
  0x23   : > { %p1218_p11 = pneg %p1217_p8 }
  0x25   : > { %p1225_p10 = pnand %p1224_p5, %p1218_p11 }
  0x27   : > { %1228 = shalt.err (!%p1225_p10)
}
  0x28   : > { %s1298_s8 = smov 128   ;;  %s1299_s9 = smov 8  }
  0x29   : > { %1153 = dma.hbm_to_vmem [thread:$0]  (!%p1400_p12), %s1540_s5, 8192, %s231_s15, [#allocation3], %s1298_s8, %s1298_s8, %s1299_s9  }
  0x2a   : > { %p1550_p13 = scmp.ne.s32.totalorder %s1548_s13, 0 }
  0x2b   : > { %p1551_p1 = scmp.eq.s32.totalorder (!%p1550_p13), %s1364_s28, 0 }
  0x2c   : > { %265 = sbr.rel (%p1550_p13) target bundleno = 1193 (0x4a9), region = 48 }
  0x33   : > { %1274 = dma.done.wait (%p1551_p1), [#allocation3], 8192   ;;  %p1552_p0 = pmov %p1551_p1 }
  0x34   : > { %p302_p5 = scmp.lt.s32.totalorder %s1364_s28, 1  ;;  %vm324_vm0 = vcmask 64512   ;;  %v316_v0 = vld [vmem:[%s1538_s3] sm:$0xff]  ;;  %vm408_vm1 = vcmask 130048   ;;  %v507_v11 = vld [vmem:[#allocation2 + $0x88] sm:$0xff]  ;;  %v508_v17 = vld [vmem:[#allocation2 + $0x90] sm:$0xff] }
  0x35   : > { %1276 = vsyncadd (%p1552_p0), [#allocation3], 4294959104  ;;  %1053 = vmatprep.subr.mxu0 %v316_v0  ;;  %v950_v4 = vld [vmem:[%s1539_s4] ss:$0 sm:$0xff]  ;;  %v491_v16 = vld [vmem:[#allocation2 + $0x8] sm:$0xff]  ;;  %s299_s22 = sand.u32 1, %s1287_s25  }
  0x36   : > { %s303_s18 = scalar_select %p302_p5, %s1364_s28, 1  ;;  %1054 = vmatpush3.msra.mxu0 %v316_v0  ;;  %v506_v10 = vld [vmem:[#allocation2 + $0x80] sm:$0xff]  ;;  %v509_v18 = vld [vmem:[#allocation2 + $0x98] sm:$0xff]  ;;  %v492_v22 = vld [vmem:[#allocation2 + $0x10] sm:$0xff]  ;;  %vm839_vm8 = vcmask 1040384  }
  0x37   : > { %v1076_v14 = vpack.c.bf16 %v507_v11, %v506_v10  ;;  %v490_v15 = vld [vmem:[#allocation2] sm:$0xff]  ;;  %v1080_v21 = vpack.c.bf16 %v509_v18, %v508_v17  ;;  %v493_v23 = vld [vmem:[#allocation2 + $0x18] sm:$0xff]  ;;  %v511_v25 = vld [vmem:[#allocation2 + $0xa8] sm:$0xff]  ;;  %s945_s13 = sshll.u32 %s299_s22, 1  ;;  %s961_s23 = sshll.u32 %s1364_s28, 5 }
  0x38   : > { %s964_s19 = sshll.u32 %s303_s18, 4  ;;  %v1078_v20 = vpack.c.bf16 %v491_v16, %v490_v15  ;;  %v510_v24 = vld [vmem:[#allocation2 + $0xa0] sm:$0xff]  ;;  %v1082_v26 = vpack.c.bf16 %v493_v23, %v492_v22  ;;  %v495_v29 = vld [vmem:[#allocation2 + $0x28] sm:$0xff]  ;;  %v512_v30 = vld [vmem:[#allocation2 + $0xb0] sm:$0xff]  ;;  %s1493_s17 = scalar_lea.hbm %s1542_s7, %s961_s23 }
  0x39   : > { %s306_s21 = scalar_lea.vmem %s1535_s0, %s964_s19  ;;  %s311_s29 = scalar_lea.vmem %s1536_s1, %s964_s19  ;;  %v1084_v27 = vpack.c.bf16 %v511_v25, %v510_v24  ;;  %v494_v28 = vld [vmem:[#allocation2 + $0x20] sm:$0xff]  ;;  %v513_v31 = vld [vmem:[#allocation2 + $0xb8] sm:$0xff]  ;;  %v496_v34 = vld [vmem:[#allocation2 + $0x30] sm:$0xff] }
  0x3a   : > { %v312_v1 = vld [vmem:[%s306_s21] sm:$0xff]  ;;  %v313_v2 = vld [vmem:[%s306_s21 + $0x8] sm:$0xff]  ;;  %v1086_v32 = vpack.c.bf16 %v495_v29, %v494_v28  ;;  %v1088_v33 = vpack.c.bf16 %v513_v31, %v512_v30  ;;  %v497_v35 = vld [vmem:[#allocation2 + $0x38] sm:$0xff]  ;;  %s843_s18 = scalar_lea.sflag [#allocation4], %s299_s22  ;;  %p1553_p9 = scmp.ne.s32.totalorder %s1546_s11, 0 }
  0x3b   : > { %1055 = vmatprep.mubr.msk.f32.mxu0 %vm324_vm0, %v312_v1  ;;  %v314_v3 = vld [vmem:[%s311_s29] sm:$0xff]  ;;  %v1452_v19 = vld [vmem:[%s311_s29 + $0x8] sm:$0xff]  ;;  %v1090_v38 = vpack.c.bf16 %v497_v35, %v496_v34  ;;  %v516_v42 = vld [vmem:[#allocation2 + $0xd0] sm:$0xff]  ;;  %s301_s29 = scalar_lea.vmem [#allocation5], %s945_s13  ;;  %s1302_s28 = smov [#allocation5]  }
  0x3c   : > { %1056 = vmatmul.mubr.msk.f32.vlgmr.msra.gmra.mrb[0].mxu0 %vm324_vm0, %v313_v2  ;;  %1069 = vmatprep.mubr.msk.f32.mxu1 %vm408_vm1, %v314_v3  ;;  %v514_v36 = vld [vmem:[#allocation2 + $0xc0] sm:$0xff]  ;;  %v515_v37 = vld [vmem:[#allocation2 + $0xc8] sm:$0xff]  ;;  %v517_v43 = vld [vmem:[#allocation2 + $0xd8] sm:$0xff]  ;;  %s856_s8 = sshll.u32 %s301_s29, 4  ;;  %s1233_s20 = sshll.u32 %s1302_s28, 4  ;;  %s1495_s8 = int_to_ptr.vmem [resolvable:$true] %s856_s8  ;;  %s1234_s20 = int_to_ptr.vmem [resolvable:$false] %s1233_s20 }
  0x3d   : > { %1062 = vmatprep.mubr.msk.f32.mxu0 %vm408_vm1, %v314_v3  ;;  %v1092_v39 = vpack.c.bf16 %v515_v37, %v514_v36  ;;  %v498_v40 = vld [vmem:[#allocation2 + $0x40] sm:$0xff]  ;;  %v499_v41 = vld [vmem:[#allocation2 + $0x48] sm:$0xff]  ;;  %v1096_v45 = vpack.c.bf16 %v517_v43, %v516_v42  ;;  %v500_v46 = vld [vmem:[#allocation2 + $0x50] sm:$0xff]  ;;  %s1229_s19 = scalar_lea.vmem %s1495_s8, 32  ;;  %s1235_s16 = scalar_lea.vmem %s1234_s20, 64 }
  0x3e   : > { %v1094_v44 = vpack.c.bf16 %v499_v41, %v498_v40  ;;  %v501_v47 = vld [vmem:[#allocation2 + $0x58] sm:$0xff]  ;;  %v518_v48 = vld [vmem:[#allocation2 + $0xe0] sm:$0xff]  ;;  %v519_v49 = vld [vmem:[#allocation2 + $0xe8] sm:$0xff]  ;;  %p1230_p6 = scmp.ne.s32.totalorder %s1495_s8, %s1229_s19  ;;  %p1236_p2 = scmp.lt.s32.totalorder %s1495_s8, %s1234_s20 }
  0x3f   : > { %v1098_v50 = vpack.c.bf16 %v501_v47, %v500_v46  ;;  %v1100_v51 = vpack.c.bf16 %v519_v49, %v518_v48  ;;  %v502_v52 = vld [vmem:[#allocation2 + $0x60] sm:$0xff]  ;;  %v503_v53 = vld [vmem:[#allocation2 + $0x68] sm:$0xff]  ;;  %v520_v54 = vld [vmem:[#allocation2 + $0xf0] sm:$0xff]  ;;  %p1237_p3 = scmp.lt.s32.totalorder %s1235_s16, %s1229_s19 }
  0x40   : > { %v521_v55 = vld [vmem:[#allocation2 + $0xf8] sm:$0xff]  ;;  %v1102_v56 = vpack.c.bf16 %v503_v53, %v502_v52  ;;  %v504_v58 = vld [vmem:[#allocation2 + $0x70] sm:$0xff]  ;;  %v955_v2 = vld [vmem:[%s1541_s6] ss:$0 sm:$0xff]  ;;  %p1231_p10 = pnand %p1230_p6, %p1553_p9 }
  0x41   : > { %v1104_v57 = vpack.c.bf16 %v521_v55, %v520_v54  ;;  %v505_v59 = vld [vmem:[#allocation2 + $0x78] sm:$0xff]  ;;  %v699_v11 = vld [vmem:[#allocation2 + $0x188] sm:$0xff]  ;;  %v700_v16 = vld [vmem:[#allocation2 + $0x190] sm:$0xff]  ;;  %p1238_p4 = por %p1237_p3, %p1236_p2 }
  0x42   : > { %v1106_v60 = vpack.c.bf16 %v505_v59, %v504_v58  ;;  %v683_v15 = vld [vmem:[#allocation2 + $0x108] sm:$0xff]  ;;  %v701_v17 = vld [vmem:[#allocation2 + $0x198] sm:$0xff]  ;;  %v702_v23 = vld [vmem:[#allocation2 + $0x1a0] sm:$0xff]  ;;  %p1232_p12 = pneg %p1231_p10 }
  0x43   : > { %v685_v22 = vld [vmem:[#allocation2 + $0x118] sm:$0xff]  ;;  %v703_v24 = vld [vmem:[#allocation2 + $0x1a8] sm:$0xff]  ;;  %v704_v29 = vld [vmem:[#allocation2 + $0x1b0] sm:$0xff] }
  0x44   : > { %v687_v28 = vld [vmem:[#allocation2 + $0x128] sm:$0xff]  ;;  %v705_v30 = vld [vmem:[#allocation2 + $0x1b8] sm:$0xff]  ;;  %v706_v35 = vld [vmem:[#allocation2 + $0x1c0] sm:$0xff]  ;;  %p1239_p7 = pnand %p1238_p4, %p1232_p12 }
  0x45   : > { %v689_v34 = vld [vmem:[#allocation2 + $0x138] sm:$0xff]  ;;  %v707_v36 = vld [vmem:[#allocation2 + $0x1c8] sm:$0xff]  ;;  %v708_v40 = vld [vmem:[#allocation2 + $0x1d0] sm:$0xff] }
  0x46   : > { %v709_v41 = vld [vmem:[#allocation2 + $0x1d8] sm:$0xff]  ;;  %v710_v46 = vld [vmem:[#allocation2 + $0x1e0] sm:$0xff]  ;;  %v711_v47 = vld [vmem:[#allocation2 + $0x1e8] sm:$0xff] }
  0x47   : > { %v1132_v43 = vpack.c.bf16 %v709_v41, %v708_v40  ;;  %v1136_v49 = vpack.c.bf16 %v711_v47, %v710_v46  ;;  %v712_v52 = vld [vmem:[#allocation2 + $0x1f0] sm:$0xff]  ;;  %v713_v53 = vld [vmem:[#allocation2 + $0x1f8] sm:$0xff]  ;;  %v799_v59 = vld [vmem:[%s1537_s2] sm:$0xff] }
  0x48   : > { %v1140_v55 = vpack.c.bf16 %v713_v53, %v712_v52  ;;  %vm801_vm2 = vcmp.gt.f32.partialorder %v799_v59, 0.5 }
 0x10f   : > { %v1057_v5 = vpop.f32.mrb[0].mxu0 }
 0x110   : > { %v1442_v6 = vadd.f32 %v1057_v5, %v950_v4  ;;  %v397_v7 = vpop.f32.mrb[1].mxu0 }
 0x111   : > { %v1444_v8 = vadd.f32 %v950_v4, %v397_v7 }
 0x112   : > { %v407_v9 = vmax.f32 %v1442_v6, 0.0 }
 0x113   : > { %v406_v12 = vmax.f32 %v1444_v8, 0.0  ;;  %v698_v8 = vld [vmem:[#allocation2 + $0x180] sm:$0xff] }
 0x115   : > { %v1072_v13 = vpack.c.bf16 %v407_v9, %v406_v12 }
 0x117   : > { %1073 = vmatprep.subr.bf16.mxu0 %v1072_v13 }
 0x118   : > { %1075 = vmatpush3.bf16.msra.mxu0 %v1072_v13  ;;  %v1112_v13 = vpack.c.bf16 %v699_v11, %v698_v8 }
 0x119   : > { %1077 = vmatprep.subr.bf16.mxu0 %v1076_v14  ;;  %v682_v14 = vld [vmem:[#allocation2 + $0x100] sm:$0xff] }
 0x11a   : > { %v1114_v18 = vpack.c.bf16 %v683_v15, %v682_v14 }
 0x11b   : > { %1063 = vmatmul.mubr.msk.f32.vlgmr.msra.gmra.mrb[2].mxu0 %vm408_vm1, %v1452_v19 }
 0x11c   : > { %1079 = vmatpush3.bf16.msra.mxu0 %v1078_v20  ;;  %v1116_v20 = vpack.c.bf16 %v701_v17, %v700_v16 }
 0x11d   : > { %1081 = vmatprep.subr.bf16.mxu0 %v1080_v21  ;;  %v684_v21 = vld [vmem:[#allocation2 + $0x110] sm:$0xff] }
 0x11e   : > { %v1118_v25 = vpack.c.bf16 %v685_v22, %v684_v21 }
 0x120   : > { %1083 = vmatpush3.bf16.msra.mxu0 %v1082_v26  ;;  %v1120_v26 = vpack.c.bf16 %v703_v24, %v702_v23 }
 0x121   : > { %1085 = vmatprep.subr.bf16.mxu0 %v1084_v27  ;;  %v686_v27 = vld [vmem:[#allocation2 + $0x120] sm:$0xff] }
 0x122   : > { %v1122_v31 = vpack.c.bf16 %v687_v28, %v686_v27 }
 0x124   : > { %1087 = vmatpush3.bf16.msra.mxu0 %v1086_v32  ;;  %v1124_v32 = vpack.c.bf16 %v705_v30, %v704_v29 }
 0x125   : > { %1089 = vmatprep.subr.bf16.mxu0 %v1088_v33  ;;  %v688_v33 = vld [vmem:[#allocation2 + $0x130] sm:$0xff] }
 0x126   : > { %v1126_v37 = vpack.c.bf16 %v689_v34, %v688_v33 }
 0x128   : > { %1091 = vmatpush3.bf16.msra.mxu0 %v1090_v38  ;;  %v690_v38 = vld [vmem:[#allocation2 + $0x140] sm:$0xff] }
 0x129   : > { %1093 = vmatprep.subr.bf16.mxu0 %v1092_v39  ;;  %v691_v39 = vld [vmem:[#allocation2 + $0x148] sm:$0xff] }
 0x12a   : > { %v1130_v42 = vpack.c.bf16 %v691_v39, %v690_v38 }
 0x12c   : > { %1095 = vmatpush3.bf16.msra.mxu0 %v1094_v44  ;;  %v692_v44 = vld [vmem:[#allocation2 + $0x150] sm:$0xff] }
 0x12d   : > { %1097 = vmatprep.subr.bf16.mxu0 %v1096_v45  ;;  %v693_v45 = vld [vmem:[#allocation2 + $0x158] sm:$0xff] }
 0x12e   : > { %v1134_v48 = vpack.c.bf16 %v693_v45, %v692_v44 }
 0x130   : > { %1099 = vmatpush3.bf16.msra.mxu0 %v1098_v50  ;;  %v694_v50 = vld [vmem:[#allocation2 + $0x160] sm:$0xff] }
 0x131   : > { %1101 = vmatprep.subr.bf16.mxu0 %v1100_v51  ;;  %v695_v51 = vld [vmem:[#allocation2 + $0x168] sm:$0xff] }
 0x132   : > { %v1138_v54 = vpack.c.bf16 %v695_v51, %v694_v50 }
 0x134   : > { %1103 = vmatpush3.bf16.msra.mxu0 %v1102_v56  ;;  %v696_v56 = vld [vmem:[#allocation2 + $0x170] sm:$0xff] }
 0x135   : > { %1105 = vmatprep.subr.bf16.mxu0 %v1104_v57  ;;  %v697_v57 = vld [vmem:[#allocation2 + $0x178] sm:$0xff] }
 0x136   : > { %v1142_v58 = vpack.c.bf16 %v697_v57, %v696_v56 }
 0x138   : > { %1107 = vmatpush3.bf16.msra.mxu0 %v1106_v60  ;;  %v800_v60 = vld [vmem:[%s1537_s2 + $0x8] sm:$0xff] }
 0x139   : > { %vm802_vm3 = vcmp.gt.f32.partialorder %v800_v60, 0.5 }
 0x1ee   : > { %v1064_v61 = vpop.f32.mrb[2].mxu0 }
 0x1ef   : > { %v481_v62 = vpop.f32.mrb[3].mxu0 }
 0x1f0   : > { %593 = vmatprep.mubr.f32.mxu0 %v481_v62  ;;  %v1301_v62 = vmov 0  }
 0x1f1   : > { %594 = vmatmul.mubr.f32.vlgmr.msra.gmra.mrb[4].mxu0 %v406_v12  ;;  %1198 = vset.pattern.permute.xlu0 %v1301_v62 }
 0x1f2   : > { %598 = vmatprep.mubr.f32.mxu0 %v1064_v61  ;;  %v1300_v61 = vmov 1  }
 0x1f3   : > { %1199 = vset.pattern.permute.xlu1 %v1300_v61 }
 0x1f5   : > { %599 = vmatmul.mubr.f32.gmra.mrb[6].mxu0 %v407_v9 }
 0x2c4   : > { %v1005_v63 = vpop.f32.mrb[4].mxu0 }
 0x2c5   : > { %v1006_v0 = vpop.f32.mrb[5].mxu0 }
 0x2c6   : > { %v1007_v1 = vadd.f32 %v1006_v0, %v1005_v63  ;;  %v803_v63 = vsel %vm801_vm2, 1, %v1301_v62  ;;  %v804_v0 = vsel %vm802_vm3, 1, %v1301_v62 }
 0x2c7   : > { %823 = vperm.xlu1 %1199, %v803_v63   ;;  %806 = vperm.xlu0 %1198, %v803_v63  }
 0x2c8   : > { %v1008_v3 = vpop.f32.mrb[6].mxu0  ;;  %v1463_v5 = vadd.f32 %v1007_v1, %v955_v2 }
 0x2c9   : > { %v1009_v4 = vpop.f32.mrb[7].mxu0 }
 0x2ca   : > { %v1010_v7 = vadd.f32 %v1009_v4, %v1008_v3  ;;  %v604_v12 = vmax.f32 %v1463_v5, 0.0  ;;  %v959_v4 = vld [vmem:[%s1541_s6 + $0x1] ss:$0 sm:$0xff] }
 0x2cb   : > { %826 = vperm.xlu1 %1199, %v804_v0   ;;  %809 = vperm.xlu0 %1198, %v804_v0  }
 0x2cc   : > { %v1465_v10 = vadd.f32 %v1010_v7, %v955_v2 }
 0x2ce   : > { %v605_v6 = vmax.f32 %v1465_v10, 0.0 }
 0x2cf   : > { %1200 = vset.pattern.permute.xlu0 %v1300_v61 }
 0x2d0   : > { %v1108_v9 = vpack.c.bf16 %v605_v6, %v604_v12 }
 0x2d2   : > { %1109 = vmatprep.subr.bf16.mxu1 %v1108_v9 }
 0x2d3   : > { %1111 = vmatpush3.bf16.msra.mxu1 %v1108_v9 }
 0x2d4   : > { %1113 = vmatprep.subr.bf16.mxu1 %v1112_v13 }
 0x2d6   : > { %1070 = vmatmul.mubr.msk.f32.vlgmr.msra.gmra.mrb[0].mxu1 %vm408_vm1, %v1452_v19  ;;  %v1128_v19 = vpack.c.bf16 %v707_v36, %v706_v35 }
 0x2d7   : > { %1115 = vmatpush3.bf16.msra.mxu1 %v1114_v18 }
 0x2d8   : > { %1117 = vmatprep.subr.bf16.mxu1 %v1116_v20 }
 0x2db   : > { %1119 = vmatpush3.bf16.msra.mxu1 %v1118_v25 }
 0x2dc   : > { %1121 = vmatprep.subr.bf16.mxu1 %v1120_v26 }
 0x2df   : > { %1123 = vmatpush3.bf16.msra.mxu1 %v1122_v31 }
 0x2e0   : > { %1125 = vmatprep.subr.bf16.mxu1 %v1124_v32 }
 0x2e3   : > { %1127 = vmatpush3.bf16.msra.mxu1 %v1126_v37 }
 0x2e4   : > { %1129 = vmatprep.subr.bf16.mxu1 %v1128_v19 }
 0x2e7   : > { %1131 = vmatpush3.bf16.msra.mxu1 %v1130_v42 }
 0x2e8   : > { %1133 = vmatprep.subr.bf16.mxu1 %v1132_v43 }
 0x2eb   : > { %1135 = vmatpush3.bf16.msra.mxu1 %v1134_v48 }
 0x2ec   : > { %1137 = vmatprep.subr.bf16.mxu1 %v1136_v49 }
 0x2ef   : > { %1139 = vmatpush3.bf16.msra.mxu1 %v1138_v54 }
 0x2f0   : > { %1141 = vmatprep.subr.bf16.mxu1 %v1140_v55 }
 0x2f3   : > { %1143 = vmatpush3.bf16.msra.mxu1 %v1142_v58 }
 0x346   : > { %v824_v11 = vpop.permute.xlu1 %823  ;;  %v807_v9 = vpop.permute.xlu0 %806 }
 0x347   : > { %vm828_vm4 = vcmp.eq.s32.totalorder %v824_v11, 1  ;;  %vm811_vm5 = vcmp.eq.s32.totalorder %v807_v9, 1 }
 0x34a   : > { %v827_v17 = vpop.permute.xlu1 %826  ;;  %v810_v10 = vpop.permute.xlu0 %809 }
 0x34b   : > { %vm829_vm6 = vcmp.eq.s32.totalorder %v827_v17, 1  ;;  %vm812_vm7 = vcmp.eq.s32.totalorder %v810_v10, 1 }
 0x3a9   : > { %v1071_v1 = vpop.f32.mrb[0].mxu1 }
 0x3aa   : > { %v672_v2 = vpop.f32.mrb[1].mxu1 }
 0x3ab   : > { %786 = vmatprep.mubr.f32.mxu1 %v672_v2 }
 0x3ac   : > { %787 = vmatmul.mubr.f32.vlgmr.msra.gmra.mrb[2].mxu1 %v604_v12 }
 0x3ad   : > { %791 = vmatprep.mubr.f32.mxu1 %v1071_v1 }
 0x3b0   : > { %792 = vmatmul.mubr.f32.gmra.mrb[4].mxu1 %v605_v6 }
 0x47f   : > { %v1047_v3 = vpop.f32.mrb[2].mxu1 }
 0x480   : > { %v1048_v7 = vpop.f32.mrb[3].mxu1 }
 0x481   : > { %v1049_v8 = vadd.f32 %v1048_v7, %v1047_v3 }
 0x483   : > { %v789_v13 = vadd.f32 %v1049_v8, %v959_v4  ;;  %v1050_v14 = vpop.f32.mrb[4].mxu1 }
 0x484   : > { %v1051_v15 = vpop.f32.mrb[5].mxu1 }
 0x485   : > { %v1052_v16 = vadd.f32 %v1051_v15, %v1050_v14  ;;  %v797_v5 = vmax.f32 %v789_v13, 0.0 }
 0x487   : > { %v794_v12 = vadd.f32 %v1052_v16, %v959_v4  ;;  %v830_v18 = vsel %vm828_vm4, %v797_v5, -1e+30  ;;  %v813_v20 = vsel %vm811_vm5, %v797_v5, -1e+30 }
 0x489   : > { %v798_v6 = vmax.f32 %v794_v12, 0.0 }
 0x48b   : > { %v831_v21 = vsel %vm829_vm6, %v798_v6, -1e+30  ;;  %v814_v22 = vsel %vm812_vm7, %v798_v6, -1e+30 }
 0x48c   : > { %v832_v23 = vmax.f32 %v830_v18, %v831_v21  ;;  %v815_v24 = vmax.f32 %v813_v20, %v814_v22 }
 0x48e   : > { %v833_v25 = vrot.slane %v832_v23, 4  ;;  %v816_v26 = vrot.slane %v815_v24, 4 }
 0x490   : > { %v834_v27 = vmax.f32 %v832_v23, %v833_v25  ;;  %v817_v28 = vmax.f32 %v815_v24, %v816_v26 }
 0x492   : > { %v835_v29 = vrot.slane %v834_v27, 2  ;;  %v818_v30 = vrot.slane %v817_v28, 2 }
 0x494   : > { %v836_v31 = vmax.f32 %v834_v27, %v835_v29  ;;  %v819_v32 = vmax.f32 %v817_v28, %v818_v30 }
 0x496   : > { %v837_v33 = vrot.slane %v836_v31, 1  ;;  %v820_v34 = vrot.slane %v819_v32, 1 }
 0x498   : > { %v838_v35 = vmax.f32 %v836_v31, %v837_v33  ;;  %v821_v36 = vmax.f32 %v819_v32, %v820_v34 }
 0x49a   : > { %v840_v37 = vsel %vm839_vm8, %v821_v36, %v838_v35 }
 0x49b   : > { %841 = vst [vmem:[%s301_s29] sm:$0x3] %v840_v37 }
 0x49c   : > { %1242 = shalt.err (!%p1239_p7)
}
 0x49d   : > { %s1243_s21 = scalar_lea.hbm %s1493_s17, 32  ;;  %s1247_s13 = scalar_lea.hbm %s1542_s7, 64 }
 0x49e   : > { %p1244_p8 = scmp.ne.s32.totalorder %s1493_s17, %s1243_s21  ;;  %p1248_p1 = scmp.lt.u32.totalorder %s1493_s17, %s1542_s7 }
 0x49f   : > { %p1249_p0 = scmp.lt.u32.totalorder %s1247_s13, %s1243_s21  ;;  %p1251_p6 = scmp.lt.u32.totalorder %s1243_s21, %s1493_s17 }
 0x4a0   : > { %p1245_p11 = pnand %p1244_p8, %p1553_p9 }
 0x4a1   : > { %p1250_p5 = por %p1249_p0, %p1248_p1 }
 0x4a2   : > { %p1246_p13 = pneg %p1245_p11 }
 0x4a3   : > { %p1252_p10 = por %p1251_p6, %p1250_p5 }
 0x4a5   : > { %p1253_p12 = pnand %p1252_p10, %p1246_p13 }
 0x4a7   : > { %1256 = shalt.err (!%p1253_p12)
}
 0x4a8   : > { %1148 = dma.vmem_to_hbm [thread:$0]  (%p1553_p9), %s1495_s8, 32, %s1493_s17, %s843_s18  }
 0x4a9 PF: > { %p1160_p2 = scmp.ge.s32.totalorder %s1295_s27, 2  ;;  %s868_s9 = sand.u32 1, %s1283_s24  }
 0x4aa   : > { %p1554_p3 = scmp.ne.s32.totalorder %s1547_s12, 0  ;;  %s869_s14 = scalar_lea.sflag [#allocation4], %s868_s9 }
 0x4ac   : > { %p1155_p4 = pnand %p1160_p2, %p1554_p3 }
 0x4ae   : > { %1278 = dma.done.wait (!%p1155_p4), %s869_s14, 32  }
 0x4af   : > { %1280 = vsyncadd (!%p1155_p4), %s869_s14, 4294967264  ;;  %p18_p7 = scmp.ge.s32.totalorder %s1368_s30, 4   ;;  %s1555_s24 = smov %s1287_s25 }
 0x4b0   : > { %s1556_s25 = smov %s1291_s26  ;;  %s1557_s26 = smov %s1379_s10 }
 0x4b1   : > { %s1558_s27 = smov %s1368_s30  ;;  %20 = sbr.rel (!%p18_p7) target bundleno = 4 (0x4), region = 93 }
 0x4b8   :  { %874 = vsyncpa [#allocation3], 1 }
 0x4b9   :  { %876 = vsyncpa [#allocation3 + $0x1], 1 }
 0x4ba   :  { %877 = vsyncpa [#allocation4], 1 }
 0x4bb   :  { %879 = vsyncpa [#allocation4 + $0x1], 1 }

</bundles_post_ra>
